<compile_context>
chip_gen: v5e
topology: v5e:2x2
jax: 0.10.0
libtpu: 0.0.40
codegen_flags: <defaults>
</compile_context>

<pallas_src>
import jax
import jax.numpy as jnp
from jax.experimental import pallas as pl
from jax.experimental.pallas import tpu as pltpu


def _dma_identity_kernel(x_hbm_ref, o_hbm_ref, sem):
    # Whole-array HBM -> HBM DMA: no VMEM staging, no vreg traffic, no grid.
    cp = pltpu.make_async_copy(x_hbm_ref, o_hbm_ref, sem)
    cp.start()
    cp.wait()


def _pallas_identity(state: jax.Array) -> jax.Array:
    """Single-DMA identity copy of `state`, layout-preserving (no reshapes)."""
    return pl.pallas_call(
        _dma_identity_kernel,
        out_shape=jax.ShapeDtypeStruct(state.shape, state.dtype),
        in_specs=[pl.BlockSpec(memory_space=pl.ANY)],   # raw HBM ref, no auto-DMA
        out_specs=pl.BlockSpec(memory_space=pl.ANY),     # raw HBM ref, no auto-DMA
        scratch_shapes=[pltpu.SemaphoreType.DMA],
    )(state)


# One dispatch for the whole passthrough path.
_jit_pallas_identity = jax.jit(_pallas_identity)


def base_predictor_state_passthrough(state: jax.Array) -> jax.Array:
    """Identity pass over `state` via a raw HBM→HBM DMA Pallas kernel.

    This is the only real data path BasePredictor exposes; it exists so the
    Pallas plumbing is exercised/testable.  Natural layout is preserved, so
    there is no relayout copy on either side of the kernel.
    """
    return _jit_pallas_identity(state)


def base_predictor_forward(state: jax.Array):
    """Exact semantics of BasePredictor.forward(state): returns None.

    Per the performance review, a semantic no-op must not launch a kernel:
    no HBM traffic, no dispatch, no host sync.
    """
    # TODO(synk): forward() is `pass` in the reference — intentionally no work.
    return None


if __name__ == "__main__":
    key = jax.random.PRNGKey(0)
    # Small NCHW state consistent with a predictor over image-like input.
    state = jax.random.normal(key, (2, 4, 16, 16), dtype=jnp.float32)

    # Test-only verification of the DMA identity kernel (kept OUT of forward()).
    out = base_predictor_state_passthrough(state)
    jax.block_until_ready(out)
    assert out.shape == state.shape and out.dtype == state.dtype
    assert bool(jnp.array_equal(out, state, equal_nan=True))

    # Faithful forward(): returns None, launches nothing.
    result = base_predictor_forward(state)
    assert result is None
    print("KERNEL_OK")
</pallas_src>

<mosaic_0001>
module attributes {stable_mosaic.version = 11 : i64} {
  func.func @_dma_identity_kernel(%arg0: memref<2x4x16x16xf32, #tpu.memory_space<any>>, %arg1: memref<2x4x16x16xf32, #tpu.memory_space<any>>, %arg2: memref<!tpu.dma_semaphore, #tpu.memory_space<semaphore_mem>>) attributes {dimension_semantics = [], scalar_prefetch = 0 : i64, scratch_operands = 1 : i64, tpu.core_type = #tpu.core_type<tc>} {
    tpu.enqueue_dma source(%arg0 : memref<2x4x16x16xf32, #tpu.memory_space<any>>) target(%arg1 : memref<2x4x16x16xf32, #tpu.memory_space<any>>) target_semaphore(%arg2 : memref<!tpu.dma_semaphore, #tpu.memory_space<semaphore_mem>>)
    tpu.wait_dma2 semaphore(%arg2 : memref<!tpu.dma_semaphore, #tpu.memory_space<semaphore_mem>>) src(%arg0 : memref<2x4x16x16xf32, #tpu.memory_space<any>>) dst(%arg1 : memref<2x4x16x16xf32, #tpu.memory_space<any>>)
    return
  }
}

</mosaic_0001>

<bundles_post_ra>
// kernel: _pallas_identity.1
= control target key start
LH: loop header
LB: loop body
LE: loop exit
PB: predicated region body
PF: predicated region fallthrough
CT: control target
= control target key end

     0   :  { %s34_s12 = smov [#allocation2]   ;;  %s35_s13 = smov [#allocation3]   ;;  %s53_s0 = inlined_call_operand.hbm [shape: f32[2,4,16,16], index: 0, kind: input, shape index: {}]   ;;  %s54_s1 = inlined_call_operand.hbm [shape: f32[2,4,16,16], index: 1, kind: output, shape index: {}]  }
   0x1   :  { %s10_s8 = sshll.u32 %s53_s0, 4  ;;  %s12_s11 = sshll.u32 %s54_s1, 4  ;;  %s11_s8 = int_to_ptr.hbm [resolvable:$true] %s10_s8  ;;  %s13_s11 = int_to_ptr.hbm [resolvable:$true] %s12_s11 }
   0x2   :  { %s36_s14 = smov 0  }
   0x3   :  { %16 = dma.general %s11_s8, 2048, %s13_s11, %s34_s12, %s35_s13, [#allocation4], %s36_s14, 0  }
   0x4   :  { %32 = dma.done.wait [#allocation2], 2048 }
   0x5   :  { %33 = vsyncadd [#allocation2], 4294965248 }
   0x6   :  { %22 = vsyncmov [#allocation2] }
   0x9   :  { %s23_s15 = vpop.sfrf %22 }
   0xa   :  { %p28_p0 = scmp.ne.s32.totalorder %s23_s15, 0 }
   0xc   :  { %27 = shalt.err (%p28_p0)  }

</bundles_post_ra>
